<compile_context>
chip_gen: v7x
topology: tpu7x:2x2x1
jax: 0.10.0
libtpu: 0.0.40
codegen_flags: <defaults>
</compile_context>

<pallas_src>
import jax
import jax.numpy as jnp
from jax.experimental import pallas as pl
from jax.experimental.pallas import tpu as pltpu


_LANE = 128      # batch tile multiple of 128 -> lane-dense transposed output store
_MAX_TB = 2048   # large batch tile to amortize ~0.35us per-grid-step overhead


def _round_up(x, m):
    return ((x + m - 1) // m) * m


def _mlp_softmax_kernel(x_ref, w1_ref, b1_ref, w2_ref, b2_ref, w3_ref, b3_ref, o_ref):
    # x tile: (TB, F) f32 -> cast to bf16 in-kernel (hidden under the x DMA).
    x = x_ref[...].astype(jnp.bfloat16)

    # layer1 + ReLU   (dropout1 skipped: training=False)
    h1 = jnp.dot(x, w1_ref[...], preferred_element_type=jnp.float32) + b1_ref[...]
    h1 = jnp.maximum(h1, 0.0)

    # layer2 + ReLU   (dropout2 skipped: training=False)
    h2 = jnp.dot(h1.astype(jnp.bfloat16), w2_ref[...],
                 preferred_element_type=jnp.float32) + b2_ref[...]
    h2 = jnp.maximum(h2, 0.0)

    # output layer at the TRUE width (no 128-col padding) + row-wise softmax
    logits = jnp.dot(h2.astype(jnp.bfloat16), w3_ref[...],
                     preferred_element_type=jnp.float32) + b3_ref[...]
    m = jnp.max(logits, axis=1, keepdims=True)
    e = jnp.exp(logits - m)
    denom = jnp.sum(e, axis=1, keepdims=True)
    probs = e * pl.reciprocal(denom, approx=False)   # exact: rows sum to 1

    # Lane-dense store: (TB, out) -> (out, TB); TB is a multiple of 128.
    o_ref[...] = probs.T.astype(o_ref.dtype)


def health_diagnosis_forward(x, params):
    """x: (B, input_size) float32. params: pre-transposed weights (in,out), biases (1,out)."""
    w1, b1 = params["w1"], params["b1"]   # (in, 64), (1, 64)
    w2, b2 = params["w2"], params["b2"]   # (64, 32), (1, 32)
    w3, b3 = params["w3"], params["b3"]   # (32, out), (1, out)

    B, F = x.shape
    out_size = w3.shape[1]

    # Batch tiling: pad B to a multiple of 128 (lane-dense transposed output).
    pad_b = _round_up(B, _LANE)
    if pad_b <= _LANE:
        tb = pad_b                                   # single minimal tile
    else:
        # >= 2 grid steps (v7x megacore) while capping the tile size.
        tb = min(_MAX_TB, _round_up(pl.cdiv(pad_b, 2), _LANE))
        pad_b = _round_up(pad_b, tb)

    x_p = x if pad_b == B else jnp.pad(x, ((0, pad_b - B), (0, 0)))  # stays f32

    # Weights are tiny (~3 KiB total); one-time bf16 cast in the wrapper is noise.
    w1_bf = w1.astype(jnp.bfloat16)
    w2_bf = w2.astype(jnp.bfloat16)
    w3_bf = w3.astype(jnp.bfloat16)

    resident = lambda shape: pl.BlockSpec(shape, lambda i: (0, 0))  # VMEM-resident operand

    out_t = pl.pallas_call(
        _mlp_softmax_kernel,
        out_shape=jax.ShapeDtypeStruct((out_size, pad_b), jnp.float32),
        grid=(pad_b // tb,),
        in_specs=[
            pl.BlockSpec((tb, F), lambda i: (i, 0)),          # x: batch-tiled, double-buffered
            resident(w1_bf.shape), resident(b1.shape),
            resident(w2_bf.shape), resident(b2.shape),
            resident(w3_bf.shape), resident(b3.shape),
        ],
        out_specs=pl.BlockSpec((out_size, tb), lambda i: (0, i)),   # class-major, lane-dense
        compiler_params=pltpu.CompilerParams(
            dimension_semantics=("parallel",)),               # shard batch tiles across TCs
    )(x_p, w1_bf, b1, w2_bf, b2, w3_bf, b3)

    # Back to (B, out_size) to match the PyTorch interface.
    return out_t[:, :B].T


def init_params(key, input_size, output_size):
    """nn.Linear-style uniform(-1/sqrt(fan_in), +1/sqrt(fan_in)) init.
    Weights stored pre-transposed as (in, out); biases as (1, out)."""
    dims = [(input_size, 64), (64, 32), (32, output_size)]
    params = {}
    for idx, (fan_in, fan_out) in enumerate(dims, start=1):
        key, kw, kb = jax.random.split(key, 3)
        bound = 1.0 / jnp.sqrt(jnp.float32(fan_in))
        params[f"w{idx}"] = jax.random.uniform(
            kw, (fan_in, fan_out), jnp.float32, -bound, bound)
        params[f"b{idx}"] = jax.random.uniform(
            kb, (1, fan_out), jnp.float32, -bound, bound)
    return params


def reference_forward(x, params):
    """Pure f32 reference, exactly the PyTorch inference math."""
    h1 = jnp.maximum(x @ params["w1"] + params["b1"], 0.0)
    h2 = jnp.maximum(h1 @ params["w2"] + params["b2"], 0.0)
    logits = h2 @ params["w3"] + params["b3"]
    return jax.nn.softmax(logits, axis=1)


def emulated_reference(x, params):
    """Reference that mirrors the kernel numerics (bf16 matmul inputs, f32 accumulation)."""
    bf = jnp.bfloat16

    def lin(a, w, b):
        return jnp.dot(a.astype(bf), w.astype(bf),
                       preferred_element_type=jnp.float32) + b

    h1 = jnp.maximum(lin(x, params["w1"], params["b1"]), 0.0)
    h2 = jnp.maximum(lin(h1, params["w2"], params["b2"]), 0.0)
    return jax.nn.softmax(lin(h2, params["w3"], params["b3"]), axis=1)


# TODO(synk): training-mode dropout (p=0.5) is not implemented; inference path only.

if __name__ == "__main__":
    input_size = 16
    output_size = 8
    batch = 8

    key = jax.random.PRNGKey(0)
    key, kx = jax.random.split(key)
    x = jax.random.normal(kx, (batch, input_size), jnp.float32)
    params = init_params(key, input_size, output_size)

    out = health_diagnosis_forward(x, params)
    out = jax.block_until_ready(out)

    assert out.shape == (batch, output_size)

    # Tight check against a reference emulating the kernel's bf16/f32 numerics.
    ref_bf = emulated_reference(x, params)
    assert jnp.allclose(out, ref_bf, atol=2e-3, rtol=0), "mismatch vs bf16-emulated reference"

    # Loose check against the pure-f32 PyTorch-equivalent forward.
    ref = reference_forward(x, params)
    assert jnp.allclose(out, ref, atol=5e-2, rtol=0), "mismatch vs f32 reference"

    # Exact reciprocal => rows sum to 1 tightly.
    assert jnp.allclose(jnp.sum(out, axis=1), 1.0, atol=1e-5), "softmax rows must sum to 1"

    print("KERNEL_OK")
</pallas_src>

<mosaic_0001>
module attributes {stable_mosaic.version = 11 : i64} {
  func.func @_mlp_softmax_kernel(%arg0: i32, %arg1: memref<128x16xf32, #tpu.memory_space<vmem>>, %arg2: memref<16x64xbf16, #tpu.memory_space<vmem>>, %arg3: memref<1x64xf32, #tpu.memory_space<vmem>>, %arg4: memref<64x32xbf16, #tpu.memory_space<vmem>>, %arg5: memref<1x32xf32, #tpu.memory_space<vmem>>, %arg6: memref<32x8xbf16, #tpu.memory_space<vmem>>, %arg7: memref<1x8xf32, #tpu.memory_space<vmem>>, %arg8: memref<8x128xf32, #tpu.memory_space<vmem>>) attributes {dimension_semantics = [#tpu.dimension_semantics<parallel>], iteration_bounds = array<i64: 1>, scalar_prefetch = 0 : i64, scratch_operands = 0 : i64, tpu.core_type = #tpu.core_type<tc>, window_params = [{transform_indices = @transform_0, window_bounds = array<i64: 128, 16>}, {pipeline_mode = #tpu.pipeline_mode<synchronous>, transform_indices = @transform_1, window_bounds = array<i64: 16, 64>}, {pipeline_mode = #tpu.pipeline_mode<synchronous>, transform_indices = @transform_2, window_bounds = array<i64: 1, 64>}, {pipeline_mode = #tpu.pipeline_mode<synchronous>, transform_indices = @transform_3, window_bounds = array<i64: 64, 32>}, {pipeline_mode = #tpu.pipeline_mode<synchronous>, transform_indices = @transform_4, window_bounds = array<i64: 1, 32>}, {pipeline_mode = #tpu.pipeline_mode<synchronous>, transform_indices = @transform_5, window_bounds = array<i64: 32, 8>}, {pipeline_mode = #tpu.pipeline_mode<synchronous>, transform_indices = @transform_6, window_bounds = array<i64: 1, 8>}, {transform_indices = @transform_7, window_bounds = array<i64: 8, 128>}]} {
    %c0 = arith.constant 0 : index
    %c0_0 = arith.constant 0 : index
    %0 = vector.load %arg1[%c0, %c0_0] : memref<128x16xf32, #tpu.memory_space<vmem>>, vector<128x16xf32>
    %1 = arith.truncf %0 : vector<128x16xf32> to vector<128x16xbf16>
    %c0_1 = arith.constant 0 : index
    %c0_2 = arith.constant 0 : index
    %2 = vector.load %arg2[%c0_1, %c0_2] : memref<16x64xbf16, #tpu.memory_space<vmem>>, vector<16x64xbf16>
    %cst = arith.constant dense<0.000000e+00> : vector<128x64xf32>
    %3 = tpu.matmul %1, %2, %cst {dimension_numbers = #tpu.dot_dimension_numbers<[1], [0], [0], [1], [0, 0, 1, 1], [], []>} : vector<128x16xbf16>, vector<16x64xbf16>, vector<128x64xf32> -> vector<128x64xf32>
    %c0_3 = arith.constant 0 : index
    %c0_4 = arith.constant 0 : index
    %4 = vector.load %arg3[%c0_3, %c0_4] : memref<1x64xf32, #tpu.memory_space<vmem>>, vector<1x64xf32>
    %5 = vector.broadcast %4 : vector<1x64xf32> to vector<128x64xf32>
    %6 = arith.addf %3, %5 : vector<128x64xf32>
    %cst_5 = arith.constant 0.000000e+00 : f32
    %7 = vector.broadcast %cst_5 : f32 to vector<128x64xf32>
    %8 = arith.maximumf %6, %7 : vector<128x64xf32>
    %9 = arith.truncf %8 : vector<128x64xf32> to vector<128x64xbf16>
    %c0_6 = arith.constant 0 : index
    %c0_7 = arith.constant 0 : index
    %10 = vector.load %arg4[%c0_6, %c0_7] : memref<64x32xbf16, #tpu.memory_space<vmem>>, vector<64x32xbf16>
    %cst_8 = arith.constant dense<0.000000e+00> : vector<128x32xf32>
    %11 = tpu.matmul %9, %10, %cst_8 {dimension_numbers = #tpu.dot_dimension_numbers<[1], [0], [0], [1], [0, 0, 1, 1], [], []>} : vector<128x64xbf16>, vector<64x32xbf16>, vector<128x32xf32> -> vector<128x32xf32>
    %c0_9 = arith.constant 0 : index
    %c0_10 = arith.constant 0 : index
    %12 = vector.load %arg5[%c0_9, %c0_10] : memref<1x32xf32, #tpu.memory_space<vmem>>, vector<1x32xf32>
    %13 = vector.broadcast %12 : vector<1x32xf32> to vector<128x32xf32>
    %14 = arith.addf %11, %13 : vector<128x32xf32>
    %cst_11 = arith.constant 0.000000e+00 : f32
    %15 = vector.broadcast %cst_11 : f32 to vector<128x32xf32>
    %16 = arith.maximumf %14, %15 : vector<128x32xf32>
    %17 = arith.truncf %16 : vector<128x32xf32> to vector<128x32xbf16>
    %c0_12 = arith.constant 0 : index
    %c0_13 = arith.constant 0 : index
    %18 = vector.load %arg6[%c0_12, %c0_13] : memref<32x8xbf16, #tpu.memory_space<vmem>>, vector<32x8xbf16>
    %cst_14 = arith.constant dense<0.000000e+00> : vector<128x8xf32>
    %19 = tpu.matmul %17, %18, %cst_14 {dimension_numbers = #tpu.dot_dimension_numbers<[1], [0], [0], [1], [0, 0, 1, 1], [], []>} : vector<128x32xbf16>, vector<32x8xbf16>, vector<128x8xf32> -> vector<128x8xf32>
    %c0_15 = arith.constant 0 : index
    %c0_16 = arith.constant 0 : index
    %20 = vector.load %arg7[%c0_15, %c0_16] : memref<1x8xf32, #tpu.memory_space<vmem>>, vector<1x8xf32>
    %21 = vector.broadcast %20 : vector<1x8xf32> to vector<128x8xf32>
    %22 = arith.addf %19, %21 : vector<128x8xf32>
    %cst_17 = arith.constant dense<0xFF800000> : vector<128xf32>
    %23 = vector.multi_reduction <maximumf>, %22, %cst_17 [1] : vector<128x8xf32> to vector<128xf32>
    %24 = vector.shape_cast %23 : vector<128xf32> to vector<128x1xf32>
    %25 = vector.broadcast %24 : vector<128x1xf32> to vector<128x8xf32>
    %26 = arith.subf %22, %25 : vector<128x8xf32>
    %27 = math.exp %26 : vector<128x8xf32>
    %cst_18 = arith.constant dense<0.000000e+00> : vector<128xf32>
    %28 = vector.multi_reduction <add>, %27, %cst_18 [1] : vector<128x8xf32> to vector<128xf32>
    %29 = vector.shape_cast %28 : vector<128xf32> to vector<128x1xf32>
    %30 = tpu.reciprocal %29 : vector<128x1xf32> -> vector<128x1xf32>
    %31 = vector.broadcast %30 : vector<128x1xf32> to vector<128x8xf32>
    %32 = arith.mulf %27, %31 : vector<128x8xf32>
    %33 = tpu.transpose %32, [1, 0] : vector<128x8xf32> -> vector<8x128xf32>
    %c0_19 = arith.constant 0 : index
    %c0_20 = arith.constant 0 : index
    %34 = vector.load %arg8[%c0_19, %c0_20] : memref<8x128xf32, #tpu.memory_space<vmem>>, vector<8x128xf32>
    tpu.vector_store %arg8[%c0_19, %c0_20], %33 {strides = array<i32>} : memref<8x128xf32, #tpu.memory_space<vmem>>, vector<8x128xf32>,
    return
  }
  func.func @transform_0(%arg0: i32) -> (i32, i32) {
    %c0_i32 = arith.constant 0 : i32
    %c0_i32_0 = arith.constant 0 : i32
    return %arg0, %c0_i32 : i32, i32
  }
  func.func @transform_1(%arg0: i32) -> (i32, i32) {
    %c0_i32 = arith.constant 0 : i32
    %c0_i32_0 = arith.constant 0 : i32
    %c0_i32_1 = arith.constant 0 : i32
    return %c0_i32, %c0_i32_0 : i32, i32
  }
  func.func @transform_2(%arg0: i32) -> (i32, i32) {
    %c0_i32 = arith.constant 0 : i32
    %c0_i32_0 = arith.constant 0 : i32
    %c0_i32_1 = arith.constant 0 : i32
    return %c0_i32, %c0_i32_0 : i32, i32
  }
  func.func @transform_3(%arg0: i32) -> (i32, i32) {
    %c0_i32 = arith.constant 0 : i32
    %c0_i32_0 = arith.constant 0 : i32
    %c0_i32_1 = arith.constant 0 : i32
    return %c0_i32, %c0_i32_0 : i32, i32
  }
  func.func @transform_4(%arg0: i32) -> (i32, i32) {
    %c0_i32 = arith.constant 0 : i32
    %c0_i32_0 = arith.constant 0 : i32
    %c0_i32_1 = arith.constant 0 : i32
    return %c0_i32, %c0_i32_0 : i32, i32
  }
  func.func @transform_5(%arg0: i32) -> (i32, i32) {
    %c0_i32 = arith.constant 0 : i32
    %c0_i32_0 = arith.constant 0 : i32
    %c0_i32_1 = arith.constant 0 : i32
    return %c0_i32, %c0_i32_0 : i32, i32
  }
  func.func @transform_6(%arg0: i32) -> (i32, i32) {
    %c0_i32 = arith.constant 0 : i32
    %c0_i32_0 = arith.constant 0 : i32
    %c0_i32_1 = arith.constant 0 : i32
    return %c0_i32, %c0_i32_0 : i32, i32
  }
  func.func @transform_7(%arg0: i32) -> (i32, i32) {
    %c0_i32 = arith.constant 0 : i32
    %c0_i32_0 = arith.constant 0 : i32
    return %c0_i32, %arg0 : i32, i32
  }
}

</mosaic_0001>

<bundles_post_ra>
// kernel: tpu_custom_call.1
= control target key start
LH: loop header
LB: loop body
LE: loop exit
PB: predicated region body
PF: predicated region fallthrough
CT: control target
= control target key end

     0   :  { %vm67_vm0 = vcmask 130048   ;;  %s1307_s0 = inlined_call_operand.vmem [shape: f32[128,16], index: 0, kind: input, shape index: {}]   ;;  %s1308_s1 = inlined_call_operand.vmem [shape: bf16[16,64], index: 1, kind: input, shape index: {}]   ;;  %s1309_s2 = inlined_call_operand.vmem [shape: f32[1,64], index: 2, kind: input, shape index: {}]   ;;  %s1310_s3 = inlined_call_operand.vmem [shape: bf16[64,32], index: 3, kind: input, shape index: {}]   ;;  %s1311_s4 = inlined_call_operand.vmem [shape: f32[1,32], index: 4, kind: input, shape index: {}]   ;;  %s1312_s5 = inlined_call_operand.vmem [shape: bf16[32,8], index: 5, kind: input, shape index: {}]   ;;  %s1313_s6 = inlined_call_operand.vmem [shape: f32[1,8], index: 6, kind: input, shape index: {}]   ;;  %s1314_s7 = inlined_call_operand.hbm [shape: f32[8,128], index: 7, kind: output, shape index: {}]  }
   0x1   :  { %v897_v0 = vld [vmem:[%s1308_s1] sm:$0xff]   ;;  %v29_v2 = vld [vmem:[%s1307_s0 + $0x8] sm:$0xff]  ;;  %v30_v3 = vld [vmem:[%s1307_s0 + $0x10] sm:$0xff] }
   0x2   :  { %v28_v1 = vld [vmem:[%s1307_s0] sm:$0xff]  ;;  %832 = vmatprep.subr.bf16.mxu0 %v897_v0  ;;  %v31_v5 = vld [vmem:[%s1307_s0 + $0x18] sm:$0xff]  ;;  %v33_v7 = vld [vmem:[%s1307_s0 + $0x28] sm:$0xff]  ;;  %894 = vmatprep.subr.bf16.mxu1 %v897_v0 }
   0x3   :  { %v44_v4 = vpack.c.bf16 %v29_v2, %v28_v1  ;;  %v32_v6 = vld [vmem:[%s1307_s0 + $0x20] sm:$0xff]  ;;  %833 = vmatpush3.bf16.msra.mxu0 %v897_v0  ;;  %v45_v8 = vpack.c.bf16 %v31_v5, %v30_v3  ;;  %895 = vmatpush3.bf16.msra.mxu1 %v897_v0  ;;  %v37_v11 = vld [vmem:[%s1307_s0 + $0x48] sm:$0xff]  ;;  %v38_v12 = vld [vmem:[%s1307_s0 + $0x50] sm:$0xff] }
   0x4   :  { %v46_v9 = vpack.c.bf16 %v33_v7, %v32_v6  ;;  %v36_v10 = vld [vmem:[%s1307_s0 + $0x40] sm:$0xff]  ;;  %v39_v13 = vld [vmem:[%s1307_s0 + $0x58] sm:$0xff]  ;;  %v34_v14 = vld [vmem:[%s1307_s0 + $0x30] sm:$0xff] }
   0x5   :  { %834 = vmatprep.mubr.msk.bf16.mxu0 %vm67_vm0, %v44_v4  ;;  %v48_v15 = vpack.c.bf16 %v37_v11, %v36_v10  ;;  %v49_v16 = vpack.c.bf16 %v39_v13, %v38_v12  ;;  %v40_v17 = vld [vmem:[%s1307_s0 + $0x60] sm:$0xff]  ;;  %v41_v18 = vld [vmem:[%s1307_s0 + $0x68] sm:$0xff]  ;;  %v35_v19 = vld [vmem:[%s1307_s0 + $0x38] sm:$0xff] }
   0x6   :  { %835 = vmatmul.mubr.msk.bf16.vlgmr.msra.gmra.mrb[0].mxu0 %vm67_vm0, %v45_v8  ;;  %v50_v20 = vpack.c.bf16 %v41_v18, %v40_v17  ;;  %v42_v21 = vld [vmem:[%s1307_s0 + $0x70] sm:$0xff]  ;;  %v43_v22 = vld [vmem:[%s1307_s0 + $0x78] sm:$0xff]  ;;  %v898_v23 = vld [vmem:[%s1310_s3] sm:$0xff]   ;;  %v47_v25 = vpack.c.bf16 %v35_v19, %v34_v14 }
   0x7   :  { %838 = vmatprep.mubr.msk.bf16.mxu0 %vm67_vm0, %v46_v9  ;;  %842 = vmatprep.mubr.msk.bf16.mxu1 %vm67_vm0, %v48_v15  ;;  %v899_v24 = vld [vmem:[%s1310_s3 + $0x8] sm:$0xff]  }
   0x8   :  { %843 = vmatmul.mubr.msk.bf16.vlgmr.msra.gmra.mrb[0].mxu1 %vm67_vm0, %v49_v16  ;;  %850 = vmatprep.subr.bf16.mxu1 %v898_v23 }
   0x9   :  { %846 = vmatprep.mubr.msk.bf16.mxu1 %vm67_vm0, %v50_v20  ;;  %851 = vmatpush3.bf16.msra.mxu1 %v898_v23 }
   0xa   :  { %852 = vmatprep.subr.bf16.mxu1 %v899_v24 }
   0xb   :  { %12 = vsyncpa [#allocation3], 0  ;;  %v51_v26 = vpack.c.bf16 %v43_v22, %v42_v21  ;;  %v900_v27 = vld [vmem:[%s1310_s3 + $0x10] sm:$0xff]   ;;  %v901_v28 = vld [vmem:[%s1310_s3 + $0x18] sm:$0xff]   ;;  %vm252_vm1 = vcmask 523264   ;;  %vm421_vm2 = vcmask 261120  }
   0xc   :  { %v902_v29 = vld [vmem:[%s1312_s5] sm:$0xff]   ;;  %v903_v23 = vld [vmem:[%s1312_s5 + $0x8] sm:$0xff]   ;;  %vm543_vm3 = vcmask 64512  }
   0xd   :  { %853 = vmatpush3.bf16.msra.mxu1 %v899_v24  ;;  %874 = vmatprep.subr.bf16.mxu0 %v902_v29  ;;  %v767_v30 = vld [vmem:[%s1309_s2] ss:$0 sm:$0xff] }
   0xe   :  { %839 = vmatmul.mubr.msk.bf16.gmra.mrb[4].mxu0 %vm67_vm0, %v47_v25  ;;  %854 = vmatprep.subr.bf16.mxu1 %v900_v27  ;;  %v777_v24 = vld [vmem:[%s1311_s4] ss:$0 sm:$0xff] }
   0xf   :  { %875 = vmatpush3.bf16.msra.mxu0 %v902_v29 }
  0x10   :  { %847 = vmatmul.mubr.msk.bf16.gmra.mrb[4].mxu1 %vm67_vm0, %v51_v26  ;;  %876 = vmatprep.subr.bf16.mxu0 %v903_v23 }
  0x11   :  { %855 = vmatpush3.bf16.msra.mxu1 %v900_v27 }
  0x12   :  { %856 = vmatprep.subr.bf16.mxu1 %v901_v28 }
  0x13   :  { %877 = vmatpush3.bf16.msra.mxu0 %v903_v23 }
  0x15   :  { %857 = vmatpush3.bf16.msra.mxu1 %v901_v28 }
  0xd9   :  { %v836_v31 = vpop.f32.mrb[0].mxu0 }
  0xda   :  { %v135_v32 = vadd.f32 %v836_v31, %v767_v30  ;;  %v126_v33 = vpop.f32.mrb[1].mxu0 }
  0xdb   :  { %v127_v34 = vadd.f32 %v767_v30, %v126_v33  ;;  %v837_v35 = vpop.f32.mrb[2].mxu0  ;;  %v844_v36 = vpop.f32.mrb[0].mxu1 }
  0xdc   :  { %v138_v37 = vadd.f32 %v837_v35, %v767_v30  ;;  %v129_v38 = vpop.f32.mrb[3].mxu0  ;;  %v167_v39 = vadd.f32 %v844_v36, %v767_v30  ;;  %v158_v40 = vpop.f32.mrb[1].mxu1  ;;  %v191_v44 = vmax.f32 %v135_v32, 0.0 }
  0xdd   :  { %v130_v41 = vadd.f32 %v767_v30, %v129_v38  ;;  %v159_v42 = vadd.f32 %v767_v30, %v158_v40  ;;  %v845_v43 = vpop.f32.mrb[2].mxu1  ;;  %v189_v49 = vmax.f32 %v127_v34, 0.0 }
  0xde   :  { %v192_v45 = vmax.f32 %v138_v37, 0.0  ;;  %v199_v46 = vmax.f32 %v167_v39, 0.0  ;;  %v170_v47 = vadd.f32 %v845_v43, %v767_v30  ;;  %v161_v48 = vpop.f32.mrb[3].mxu1 }
  0xdf   :  { %v190_v50 = vmax.f32 %v130_v41, 0.0  ;;  %v197_v51 = vmax.f32 %v159_v42, 0.0  ;;  %v162_v52 = vadd.f32 %v767_v30, %v161_v48 }
  0xe0   :  { %v206_v53 = vpack.c.bf16 %v192_v45, %v191_v44  ;;  %v200_v54 = vmax.f32 %v170_v47, 0.0 }
  0xe1   :  { %v205_v55 = vpack.c.bf16 %v190_v50, %v189_v49  ;;  %v840_v56 = vpop.f32.mrb[4].mxu0  ;;  %v198_v57 = vmax.f32 %v162_v52, 0.0 }
  0xe2   :  { %v151_v58 = vadd.f32 %v840_v56, %v767_v30  ;;  %v142_v59 = vpop.f32.mrb[5].mxu0  ;;  %v210_v60 = vpack.c.bf16 %v200_v54, %v199_v46 }
  0xe3   :  { %v143_v61 = vadd.f32 %v767_v30, %v142_v59  ;;  %v841_v62 = vpop.f32.mrb[6].mxu0  ;;  %858 = vmatprep.mubr.msk.bf16.mxu1 %vm252_vm1, %v205_v55  ;;  %v209_v63 = vpack.c.bf16 %v198_v57, %v197_v51  ;;  %v848_v0 = vpop.f32.mrb[4].mxu1 }
  0xe4   :  { %v195_v1 = vmax.f32 %v151_v58, 0.0  ;;  %v154_v2 = vadd.f32 %v841_v62, %v767_v30  ;;  %v145_v3 = vpop.f32.mrb[7].mxu0  ;;  %859 = vmatmul.mubr.msk.bf16.vlgmr.msra.gmra.mrb[8].mxu1 %vm252_vm1, %v206_v53  ;;  %v183_v4 = vadd.f32 %v848_v0, %v767_v30  ;;  %v174_v5 = vpop.f32.mrb[5].mxu1 }
  0xe5   :  { %v193_v6 = vmax.f32 %v143_v61, 0.0  ;;  %v146_v7 = vadd.f32 %v767_v30, %v145_v3  ;;  %v175_v8 = vadd.f32 %v767_v30, %v174_v5  ;;  %v849_v9 = vpop.f32.mrb[6].mxu1 }
  0xe6   :  { %v196_v10 = vmax.f32 %v154_v2, 0.0  ;;  %v203_v11 = vmax.f32 %v183_v4, 0.0  ;;  %v186_v12 = vadd.f32 %v849_v9, %v767_v30  ;;  %v177_v13 = vpop.f32.mrb[7].mxu1 }
  0xe7   :  { %v194_v14 = vmax.f32 %v146_v7, 0.0  ;;  %v201_v15 = vmax.f32 %v175_v8, 0.0  ;;  %v178_v16 = vadd.f32 %v767_v30, %v177_v13 }
  0xe8   :  { %v208_v17 = vpack.c.bf16 %v196_v10, %v195_v1  ;;  %v204_v18 = vmax.f32 %v186_v12, 0.0 }
  0xe9   :  { %v207_v19 = vpack.c.bf16 %v194_v14, %v193_v6  ;;  %v202_v20 = vmax.f32 %v178_v16, 0.0 }
  0xea   :  { %v212_v21 = vpack.c.bf16 %v204_v18, %v203_v11 }
  0xeb   :  { %862 = vmatprep.mubr.msk.bf16.mxu1 %vm252_vm1, %v207_v19  ;;  %v211_v22 = vpack.c.bf16 %v202_v20, %v201_v15 }
  0xec   :  { %863 = vmatmul.mubr.msk.bf16.gmra.mrb[12].mxu1 %vm252_vm1, %v208_v17  ;;  %v790_v17 = vld [vmem:[%s1313_s6] ss:$0 sm:$0xff]  ;;  %s992_s6 = smov [#allocation2]  }
  0xed   :  { %866 = vmatprep.mubr.msk.bf16.mxu1 %vm252_vm1, %v209_v63  ;;  %s759_s23 = sshll.u32 %s992_s6, 4  ;;  %s760_s23 = int_to_ptr.vmem [resolvable:$true] %s759_s23 }
  0xee   :  { %s968_s24 = scalar_lea.vmem %s760_s23, 128  ;;  %p973_p1 = scmp.lt.s32.totalorder %s760_s23, %s760_s23 }
  0xef   :  { %p969_p0 = scmp.ne.s32.totalorder %s760_s23, %s968_s24  ;;  %p974_p2 = scmp.lt.s32.totalorder %s968_s24, %s968_s24 }
  0xf1   :  { %p975_p3 = por %p974_p2, %p973_p1 }
  0xf3   :  { %p976_p4 = pnand %p975_p3, %p969_p0 }
  0xf4   :  { %867 = vmatmul.mubr.msk.bf16.gmra.mrb[16].mxu1 %vm252_vm1, %v210_v60 }
  0xf5   :  { %870 = vmatprep.mubr.msk.bf16.mxu1 %vm252_vm1, %v211_v22 }
  0xfc   :  { %871 = vmatmul.mubr.msk.bf16.gmra.mrb[20].mxu1 %vm252_vm1, %v212_v21 }
 0x1b7   :  { %v860_v25 = vpop.f32.mrb[8].mxu1 }
 0x1b8   :  { %v320_v26 = vadd.f32 %v860_v25, %v777_v24  ;;  %v311_v27 = vpop.f32.mrb[9].mxu1 }
 0x1b9   :  { %v312_v28 = vadd.f32 %v777_v24, %v311_v27  ;;  %v861_v29 = vpop.f32.mrb[10].mxu1 }
 0x1ba   :  { %v323_v30 = vadd.f32 %v861_v29, %v777_v24  ;;  %v314_v31 = vpop.f32.mrb[11].mxu1  ;;  %v376_v33 = vmax.f32 %v320_v26, 0.0 }
 0x1bb   :  { %v315_v32 = vadd.f32 %v777_v24, %v314_v31  ;;  %v374_v35 = vmax.f32 %v312_v28, 0.0 }
 0x1bc   :  { %v377_v34 = vmax.f32 %v323_v30, 0.0 }
 0x1bd   :  { %v375_v36 = vmax.f32 %v315_v32, 0.0 }
 0x1be   :  { %v391_v37 = vpack.c.bf16 %v377_v34, %v376_v33 }
 0x1bf   :  { %v390_v38 = vpack.c.bf16 %v375_v36, %v374_v35  ;;  %v864_v39 = vpop.f32.mrb[12].mxu1 }
 0x1c0   :  { %v336_v40 = vadd.f32 %v864_v39, %v777_v24  ;;  %v327_v41 = vpop.f32.mrb[13].mxu1 }
 0x1c1   :  { %v328_v42 = vadd.f32 %v777_v24, %v327_v41  ;;  %v865_v43 = vpop.f32.mrb[14].mxu1  ;;  %878 = vmatprep.mubr.msk.bf16.mxu0 %vm421_vm2, %v390_v38 }
 0x1c2   :  { %v339_v44 = vadd.f32 %v865_v43, %v777_v24  ;;  %v330_v45 = vpop.f32.mrb[15].mxu1  ;;  %879 = vmatmul.mubr.msk.bf16.vlgmr.msra.gmra.mrb[8].mxu0 %vm421_vm2, %v391_v37  ;;  %v380_v47 = vmax.f32 %v336_v40, 0.0 }
 0x1c3   :  { %v331_v46 = vadd.f32 %v777_v24, %v330_v45  ;;  %v378_v49 = vmax.f32 %v328_v42, 0.0 }
 0x1c4   :  { %v381_v48 = vmax.f32 %v339_v44, 0.0 }
 0x1c5   :  { %v379_v50 = vmax.f32 %v331_v46, 0.0 }
 0x1c6   :  { %v393_v51 = vpack.c.bf16 %v381_v48, %v380_v47 }
 0x1c7   :  { %v392_v52 = vpack.c.bf16 %v379_v50, %v378_v49  ;;  %v868_v53 = vpop.f32.mrb[16].mxu1 }
 0x1c8   :  { %v352_v54 = vadd.f32 %v868_v53, %v777_v24  ;;  %v343_v55 = vpop.f32.mrb[17].mxu1 }
 0x1c9   :  { %v344_v56 = vadd.f32 %v777_v24, %v343_v55  ;;  %v869_v57 = vpop.f32.mrb[18].mxu1  ;;  %882 = vmatprep.mubr.msk.bf16.mxu0 %vm421_vm2, %v392_v52 }
 0x1ca   :  { %v384_v58 = vmax.f32 %v352_v54, 0.0  ;;  %v355_v59 = vadd.f32 %v869_v57, %v777_v24  ;;  %v346_v60 = vpop.f32.mrb[19].mxu1  ;;  %883 = vmatmul.mubr.msk.bf16.gmra.mrb[12].mxu0 %vm421_vm2, %v393_v51 }
 0x1cb   :  { %v382_v61 = vmax.f32 %v344_v56, 0.0  ;;  %v347_v62 = vadd.f32 %v777_v24, %v346_v60 }
 0x1cc   :  { %v385_v63 = vmax.f32 %v355_v59, 0.0 }
 0x1cd   :  { %v383_v0 = vmax.f32 %v347_v62, 0.0 }
 0x1ce   :  { %v395_v1 = vpack.c.bf16 %v385_v63, %v384_v58 }
 0x1cf   :  { %v394_v2 = vpack.c.bf16 %v383_v0, %v382_v61  ;;  %v872_v3 = vpop.f32.mrb[20].mxu1 }
 0x1d0   :  { %v368_v4 = vadd.f32 %v872_v3, %v777_v24  ;;  %v359_v5 = vpop.f32.mrb[21].mxu1 }
 0x1d1   :  { %v360_v6 = vadd.f32 %v777_v24, %v359_v5  ;;  %v873_v7 = vpop.f32.mrb[22].mxu1  ;;  %886 = vmatprep.mubr.msk.bf16.mxu0 %vm421_vm2, %v394_v2 }
 0x1d2   :  { %v388_v8 = vmax.f32 %v368_v4, 0.0  ;;  %v371_v9 = vadd.f32 %v873_v7, %v777_v24  ;;  %v362_v10 = vpop.f32.mrb[23].mxu1  ;;  %887 = vmatmul.mubr.msk.bf16.gmra.mrb[16].mxu0 %vm421_vm2, %v395_v1 }
 0x1d3   :  { %v386_v11 = vmax.f32 %v360_v6, 0.0  ;;  %v363_v12 = vadd.f32 %v777_v24, %v362_v10 }
 0x1d4   :  { %v389_v13 = vmax.f32 %v371_v9, 0.0 }
 0x1d5   :  { %v387_v14 = vmax.f32 %v363_v12, 0.0 }
 0x1d6   :  { %v397_v15 = vpack.c.bf16 %v389_v13, %v388_v8 }
 0x1d7   :  { %v396_v16 = vpack.c.bf16 %v387_v14, %v386_v11 }
 0x1d9   :  { %890 = vmatprep.mubr.msk.bf16.mxu0 %vm421_vm2, %v396_v16 }
 0x1da   :  { %891 = vmatmul.mubr.msk.bf16.gmra.mrb[20].mxu0 %vm421_vm2, %v397_v15 }
 0x295   :  { %v880_v18 = vpop.f32.mrb[8].mxu0 }
 0x296   :  { %v1135_v19 = vadd.f32 %v880_v18, %v790_v17  ;;  %v480_v20 = vpop.f32.mrb[9].mxu0 }
 0x297   :  { %v1137_v21 = vadd.f32 %v790_v17, %v480_v20  ;;  %v881_v22 = vpop.f32.mrb[10].mxu0 }
 0x298   :  { %v1139_v23 = vadd.f32 %v881_v22, %v790_v17  ;;  %v483_v24 = vpop.f32.mrb[11].mxu0  ;;  %v550_v25 = vsel %vm543_vm3, %v1135_v19, -inf }
 0x299   :  { %v1143_v26 = vadd.f32 %v790_v17, %v483_v24  ;;  %551 = vmax.xlane.f32.xlu1 %v550_v25  ;;  %v544_v27 = vsel %vm543_vm3, %v1137_v21, -inf }
 0x29a   :  { %545 = vmax.xlane.f32.xlu0 %v544_v27  ;;  %v553_v28 = vsel %vm543_vm3, %v1139_v23, -inf }
 0x29b   :  { %v547_v30 = vsel %vm543_vm3, %v1143_v26, -inf }
 0x29d   :  { %554 = vmax.xlane.f32.xlu1 %v553_v28  ;;  %v884_v29 = vpop.f32.mrb[12].mxu0 }
 0x29e   :  { %v496_v31 = vpop.f32.mrb[13].mxu0  ;;  %548 = vmax.xlane.f32.xlu0 %v547_v30  ;;  %v1153_v35 = vadd.f32 %v884_v29, %v790_v17 }
 0x29f   :  { %v1151_v32 = vadd.f32 %v790_v17, %v496_v31  ;;  %v885_v33 = vpop.f32.mrb[14].mxu0 }
 0x2a0   :  { %v499_v34 = vpop.f32.mrb[15].mxu0  ;;  %v1159_v38 = vadd.f32 %v885_v33, %v790_v17  ;;  %v562_v41 = vsel %vm543_vm3, %v1153_v35, -inf }
 0x2a1   :  { %v1155_v36 = vadd.f32 %v790_v17, %v499_v34  ;;  %v556_v37 = vsel %vm543_vm3, %v1151_v32, -inf }
 0x2a2   :  { %557 = vmax.xlane.f32.xlu0 %v556_v37  ;;  %v565_v45 = vsel %vm543_vm3, %v1159_v38, -inf }
 0x2a3   :  { %v559_v39 = vsel %vm543_vm3, %v1155_v36, -inf }
 0x2a4   :  { %560 = vmax.xlane.f32.xlu1 %v559_v39 }
 0x2a5   :  { %v888_v40 = vpop.f32.mrb[16].mxu0 }
 0x2a6   :  { %v512_v42 = vpop.f32.mrb[17].mxu0  ;;  %563 = vmax.xlane.f32.xlu0 %v562_v41  ;;  %v1169_v47 = vadd.f32 %v888_v40, %v790_v17 }
 0x2a7   :  { %v1165_v43 = vadd.f32 %v790_v17, %v512_v42  ;;  %v889_v44 = vpop.f32.mrb[18].mxu0 }
 0x2a8   :  { %v515_v46 = vpop.f32.mrb[19].mxu0  ;;  %566 = vmax.xlane.f32.xlu1 %v565_v45  ;;  %v1175_v50 = vadd.f32 %v889_v44, %v790_v17  ;;  %v574_v53 = vsel %vm543_vm3, %v1169_v47, -inf }
 0x2a9   :  { %v1171_v48 = vadd.f32 %v790_v17, %v515_v46  ;;  %v568_v49 = vsel %vm543_vm3, %v1165_v43, -inf }
 0x2aa   :  { %569 = vmax.xlane.f32.xlu0 %v568_v49  ;;  %v577_v58 = vsel %vm543_vm3, %v1175_v50, -inf }
 0x2ab   :  { %v571_v51 = vsel %vm543_vm3, %v1171_v48, -inf }
 0x2ac   :  { %572 = vmax.xlane.f32.xlu1 %v571_v51 }
 0x2ad   :  { %v892_v52 = vpop.f32.mrb[20].mxu0 }
 0x2ae   :  { %v528_v54 = vpop.f32.mrb[21].mxu0  ;;  %575 = vmax.xlane.f32.xlu0 %v574_v53  ;;  %v1181_v55 = vadd.f32 %v892_v52, %v790_v17 }
 0x2af   :  { %v1183_v56 = vadd.f32 %v790_v17, %v528_v54  ;;  %v893_v57 = vpop.f32.mrb[22].mxu0 }
 0x2b0   :  { %v531_v59 = vpop.f32.mrb[23].mxu0  ;;  %578 = vmax.xlane.f32.xlu1 %v577_v58  ;;  %v1187_v60 = vadd.f32 %v893_v57, %v790_v17  ;;  %v586_v0 = vsel %vm543_vm3, %v1181_v55, -inf }
 0x2b1   :  { %v1189_v61 = vadd.f32 %v790_v17, %v531_v59  ;;  %v580_v62 = vsel %vm543_vm3, %v1183_v56, -inf }
 0x2b2   :  { %581 = vmax.xlane.f32.xlu0 %v580_v62  ;;  %v589_v1 = vsel %vm543_vm3, %v1187_v60, -inf }
 0x2b3   :  { %v583_v63 = vsel %vm543_vm3, %v1189_v61, -inf }
 0x2b4   :  { %584 = vmax.xlane.f32.xlu1 %v583_v63 }
 0x2b6   :  { %587 = vmax.xlane.f32.xlu0 %v586_v0 }
 0x2b8   :  { %590 = vmax.xlane.f32.xlu1 %v589_v1 }
 0x326   :  { %v552_v2 = vpop.xlane.xlu1 %551 }
 0x327   :  { %v594_v3 = vsub.f32 %v1135_v19, %v552_v2  ;;  %v546_v4 = vpop.xlane.xlu0 %545 }
 0x328   :  { %v592_v5 = vsub.f32 %v1137_v21, %v546_v4 }
 0x329   :  { %v612_v6 = vmul.f32 1.442695, %v594_v3 }
 0x32a   :  { %v608_v7 = vmul.f32 1.442695, %v592_v5  ;;  %v555_v8 = vpop.xlane.xlu1 %554 }
 0x32b   :  { %904 = vpow2.f32 %v612_v6  ;;  %v595_v9 = vsub.f32 %v1139_v23, %v555_v8  ;;  %v549_v10 = vpop.xlane.xlu0 %548 }
 0x32c   :  { %v593_v11 = vsub.f32 %v1143_v26, %v549_v10  ;;  %906 = vpow2.f32 %v608_v7 }
 0x32d   :  { %v614_v12 = vmul.f32 1.442695, %v595_v9 }
 0x32e   :  { %v610_v13 = vmul.f32 1.442695, %v593_v11 }
 0x32f   :  { %v558_v14 = vpop.xlane.xlu0 %557 }
 0x330   :  { %908 = vpow2.f32 %v610_v13  ;;  %v596_v15 = vsub.f32 %v1151_v32, %v558_v14 }
 0x331   :  { %v561_v16 = vpop.xlane.xlu1 %560  ;;  %910 = vpow2.f32 %v614_v12 }
 0x332   :  { %v597_v17 = vsub.f32 %v1155_v36, %v561_v16  ;;  %v616_v22 = vmul.f32 1.442695, %v596_v15 }
 0x333   :  { %v564_v18 = vpop.xlane.xlu0 %563 }
 0x334   :  { %v618_v19 = vmul.f32 1.442695, %v597_v17  ;;  %v598_v20 = vsub.f32 %v1153_v35, %v564_v18 }
 0x335   :  { %v1206_v21 = vpop.eup %904  ;;  %v567_v23 = vpop.xlane.xlu1 %566 }
 0x336   :  { %912 = vpow2.f32 %v618_v19  ;;  %v620_v24 = vmul.f32 1.442695, %v598_v20  ;;  %v599_v25 = vsub.f32 %v1159_v38, %v567_v23  ;;  %v646_v26 = vsel %vm543_vm3, %v1206_v21, 0.0  ;;  %v1211_v27 = vpop.eup %906 }
 0x337   :  { %647 = vadd.xlane.f32.xlu0 %v646_v26  ;;  %v570_v28 = vpop.xlane.xlu0 %569  ;;  %v640_v34 = vsel %vm543_vm3, %v1211_v27, 0.0 }
 0x338   :  { %914 = vpow2.f32 %v620_v24  ;;  %v622_v29 = vmul.f32 1.442695, %v599_v25  ;;  %v600_v30 = vsub.f32 %v1165_v43, %v570_v28 }
 0x339   :  { %916 = vpow2.f32 %v616_v22  ;;  %v573_v31 = vpop.xlane.xlu1 %572 }
 0x33a   :  { %v1214_v32 = vpop.eup %908  ;;  %918 = vpow2.f32 %v622_v29  ;;  %v601_v33 = vsub.f32 %v1171_v48, %v573_v31  ;;  %v624_v40 = vmul.f32 1.442695, %v600_v30 }
 0x33b   :  { %641 = vadd.xlane.f32.xlu0 %v640_v34  ;;  %v576_v35 = vpop.xlane.xlu0 %575  ;;  %v643_v36 = vsel %vm543_vm3, %v1214_v32, 0.0  ;;  %v1221_v37 = vpop.eup %910 }
 0x33c   :  { %v626_v38 = vmul.f32 1.442695, %v601_v33  ;;  %v602_v39 = vsub.f32 %v1169_v47, %v576_v35  ;;  %644 = vadd.xlane.f32.xlu1 %v643_v36  ;;  %v649_v45 = vsel %vm543_vm3, %v1221_v37, 0.0 }
 0x33d   :  { %v579_v41 = vpop.xlane.xlu1 %578 }
 0x33e   :  { %920 = vpow2.f32 %v626_v38  ;;  %v628_v42 = vmul.f32 1.442695, %v602_v39  ;;  %v603_v43 = vsub.f32 %v1175_v50, %v579_v41 }
 0x33f   :  { %v582_v44 = vpop.xlane.xlu0 %581 }
 0x340   :  { %v1227_v46 = vpop.eup %912  ;;  %922 = vpow2.f32 %v628_v42  ;;  %v630_v48 = vmul.f32 1.442695, %v603_v43  ;;  %650 = vadd.xlane.f32.xlu1 %v649_v45  ;;  %v604_v49 = vsub.f32 %v1183_v56, %v582_v44 }
 0x341   :  { %924 = vpow2.f32 %v624_v40  ;;  %v585_v47 = vpop.xlane.xlu1 %584  ;;  %v655_v54 = vsel %vm543_vm3, %v1227_v46, 0.0 }
 0x342   :  { %v1230_v51 = vpop.eup %914  ;;  %926 = vpow2.f32 %v630_v48  ;;  %v605_v52 = vsub.f32 %v1189_v61, %v585_v47  ;;  %v632_v62 = vmul.f32 1.442695, %v604_v49 }
 0x343   :  { %v1233_v53 = vpop.eup %916  ;;  %v588_v50 = vpop.xlane.xlu0 %587  ;;  %v658_v57 = vsel %vm543_vm3, %v1230_v51, 0.0 }
 0x344   :  { %v1239_v58 = vpop.eup %918  ;;  %v634_v59 = vmul.f32 1.442695, %v605_v52  ;;  %v606_v56 = vsub.f32 %v1181_v55, %v588_v50  ;;  %656 = vadd.xlane.f32.xlu1 %v655_v54  ;;  %659 = vadd.xlane.f32.xlu0 %v658_v57  ;;  %v652_v2 = vsel %vm543_vm3, %v1233_v53, 0.0 }
 0x345   :  { %v591_v63 = vpop.xlane.xlu1 %590  ;;  %v661_v1 = vsel %vm543_vm3, %v1239_v58, 0.0 }
 0x346   :  { %928 = vpow2.f32 %v634_v59  ;;  %v636_v61 = vmul.f32 1.442695, %v606_v56  ;;  %v607_v0 = vsub.f32 %v1187_v60, %v591_v63 }
 0x348   :  { %v1247_v3 = vpop.eup %920  ;;  %930 = vpow2.f32 %v636_v61  ;;  %v638_v4 = vmul.f32 1.442695, %v607_v0  ;;  %662 = vadd.xlane.f32.xlu1 %v661_v1  ;;  %653 = vadd.xlane.f32.xlu0 %v652_v2 }
 0x349   :  { %932 = vpow2.f32 %v632_v62  ;;  %v667_v60 = vsel %vm543_vm3, %v1247_v3, 0.0 }
 0x34a   :  { %v1249_v55 = vpop.eup %922  ;;  %934 = vpow2.f32 %v638_v4 }
 0x34b   :  { %v1251_v5 = vpop.eup %924  ;;  %v670_v6 = vsel %vm543_vm3, %v1249_v55, 0.0 }
 0x34c   :  { %v1257_v7 = vpop.eup %926  ;;  %668 = vadd.xlane.f32.xlu1 %v667_v60  ;;  %671 = vadd.xlane.f32.xlu0 %v670_v6  ;;  %v664_v9 = vsel %vm543_vm3, %v1251_v5, 0.0 }
 0x34d   :  { %v673_v8 = vsel %vm543_vm3, %v1257_v7, 0.0 }
 0x350   :  { %v1263_v10 = vpop.eup %928  ;;  %674 = vadd.xlane.f32.xlu1 %v673_v8  ;;  %665 = vadd.xlane.f32.xlu0 %v664_v9 }
 0x351   :  { %v679_v13 = vsel %vm543_vm3, %v1263_v10, 0.0 }
 0x352   :  { %v1265_v11 = vpop.eup %930 }
 0x353   :  { %v1267_v12 = vpop.eup %932  ;;  %v682_v14 = vsel %vm543_vm3, %v1265_v11, 0.0 }
 0x354   :  { %v1273_v15 = vpop.eup %934  ;;  %680 = vadd.xlane.f32.xlu1 %v679_v13  ;;  %683 = vadd.xlane.f32.xlu0 %v682_v14  ;;  %v676_v17 = vsel %vm543_vm3, %v1267_v12, 0.0 }
 0x355   :  { %v685_v16 = vsel %vm543_vm3, %v1273_v15, 0.0 }
 0x358   :  { %686 = vadd.xlane.f32.xlu1 %v685_v16  ;;  %677 = vadd.xlane.f32.xlu0 %v676_v17 }
 0x3c4   :  { %v648_v18 = vpop.xlane.xlu0 %647 }
 0x3c8   :  { %v642_v19 = vpop.xlane.xlu0 %641 }
 0x3c9   :  { %936 = vrcp.f32 %v642_v19  ;;  %v645_v20 = vpop.xlane.xlu1 %644 }
 0x3ca   :  { %938 = vrcp.f32 %v645_v20 }
 0x3cb   :  { %940 = vrcp.f32 %v648_v18 }
 0x3cd   :  { %v651_v22 = vpop.xlane.xlu1 %650 }
 0x3ce   :  { %942 = vrcp.f32 %v651_v22 }
 0x3d1   :  { %v660_v23 = vpop.xlane.xlu0 %659  ;;  %v657_v29 = vpop.xlane.xlu1 %656 }
 0x3d3   :  { %v937_v24 = vpop.eup %936 }
 0x3d4   :  { %v704_v25 = vmul.f32 %v937_v24, %v1211_v27  ;;  %v939_v26 = vpop.eup %938 }
 0x3d5   :  { %v654_v28 = vpop.xlane.xlu0 %653  ;;  %v705_v30 = vmul.f32 %v939_v26, %v1214_v32  ;;  %v941_v31 = vpop.eup %940 }
 0x3d6   :  { %720 = vxpose.xlu0.b32.start [1/16] (narrow) %v704_v25, 8  ;;  %944 = vrcp.f32 %v654_v28  ;;  %v706_v33 = vmul.f32 %v941_v31, %v1206_v21  ;;  %v663_v36 = vpop.xlane.xlu1 %662 }
 0x3d7   :  { %946 = vrcp.f32 %v657_v29 }
 0x3d8   :  { %v943_v34 = vpop.eup %942  ;;  %948 = vrcp.f32 %v660_v23 }
 0x3d9   :  { %v672_v35 = vpop.xlane.xlu0 %671  ;;  %v707_v38 = vmul.f32 %v943_v34, %v1221_v37  ;;  %950 = vrcp.f32 %v663_v36 }
 0x3da   :  { %721 = vxpose.xlu0.b32.cont [2/16] (narrow) %v705_v30, 8  ;;  %v669_v32 = vpop.xlane.xlu1 %668 }
 0x3dd   :  { %v666_v39 = vpop.xlane.xlu0 %665 }
 0x3de   :  { %722 = vxpose.xlu0.b32.cont [3/16] (narrow) %v706_v33, 8  ;;  %952 = vrcp.f32 %v666_v39  ;;  %v675_v37 = vpop.xlane.xlu1 %674 }
 0x3df   :  { %954 = vrcp.f32 %v669_v32 }
 0x3e0   :  { %v945_v27 = vpop.eup %944  ;;  %956 = vrcp.f32 %v672_v35 }
 0x3e1   :  { %v708_v40 = vmul.f32 %v945_v27, %v1233_v53  ;;  %v947_v41 = vpop.eup %946  ;;  %v684_v45 = vpop.xlane.xlu0 %683  ;;  %958 = vrcp.f32 %v675_v37 }
 0x3e2   :  { %723 = vxpose.xlu0.b32.cont [4/16] (narrow) %v707_v38, 8  ;;  %v709_v42 = vmul.f32 %v947_v41, %v1227_v46  ;;  %v949_v21 = vpop.eup %948  ;;  %v681_v46 = vpop.xlane.xlu1 %680 }
 0x3e3   :  { %v710_v43 = vmul.f32 %v949_v21, %v1230_v51  ;;  %v951_v44 = vpop.eup %950 }
 0x3e4   :  { %v711_v48 = vmul.f32 %v951_v44, %v1239_v58 }
 0x3e5   :  { %v678_v47 = vpop.xlane.xlu0 %677 }
 0x3e6   :  { %724 = vxpose.xlu0.b32.cont [5/16] (narrow) %v708_v40, 8  ;;  %960 = vrcp.f32 %v678_v47  ;;  %v687_v58 = vpop.xlane.xlu1 %686 }
 0x3e7   :  { %962 = vrcp.f32 %v681_v46 }
 0x3e8   :  { %v953_v49 = vpop.eup %952  ;;  %964 = vrcp.f32 %v684_v45 }
 0x3e9   :  { %v712_v52 = vmul.f32 %v953_v49, %v1251_v5  ;;  %v955_v53 = vpop.eup %954  ;;  %966 = vrcp.f32 %v687_v58 }
 0x3ea   :  { %725 = vxpose.xlu0.b32.cont [6/16] (narrow) %v709_v42, 8  ;;  %v713_v50 = vmul.f32 %v955_v53, %v1247_v3  ;;  %v957_v51 = vpop.eup %956 }
 0x3eb   :  { %v714_v54 = vmul.f32 %v957_v51, %v1249_v55  ;;  %v959_v57 = vpop.eup %958 }
 0x3ec   :  { %v715_v59 = vmul.f32 %v959_v57, %v1257_v7 }
 0x3ee   :  { %726 = vxpose.xlu0.b32.cont [7/16] (narrow) %v710_v43, 8 }
 0x3f0   :  { %v961_v56 = vpop.eup %960 }
 0x3f1   :  { %v716_v62 = vmul.f32 %v961_v56, %v1267_v12  ;;  %v963_v63 = vpop.eup %962 }
 0x3f2   :  { %727 = vxpose.xlu0.b32.cont [8/16] (narrow) %v711_v48, 8  ;;  %v717_v61 = vmul.f32 %v963_v63, %v1263_v10  ;;  %v965_v0 = vpop.eup %964 }
 0x3f3   :  { %v718_v1 = vmul.f32 %v965_v0, %v1265_v11  ;;  %v967_v2 = vpop.eup %966 }
 0x3f4   :  { %v719_v3 = vmul.f32 %v967_v2, %v1273_v15 }
 0x3f6   :  { %728 = vxpose.xlu0.b32.cont [9/16] (narrow) %v712_v52, 8 }
 0x3fa   :  { %729 = vxpose.xlu0.b32.cont [10/16] (narrow) %v713_v50, 8 }
 0x3fe   :  { %730 = vxpose.xlu0.b32.cont [11/16] (narrow) %v714_v54, 8 }
 0x402   :  { %731 = vxpose.xlu0.b32.cont [12/16] (narrow) %v715_v59, 8 }
 0x406   :  { %732 = vxpose.xlu0.b32.cont [13/16] (narrow) %v716_v62, 8 }
 0x40a   :  { %733 = vxpose.xlu0.b32.cont [14/16] (narrow) %v717_v61, 8 }
 0x40e   :  { %734 = vxpose.xlu0.b32.cont [15/16] (narrow) %v718_v1, 8 }
 0x412   :  { %735 = vxpose.xlu0.b32.end [16/16] (narrow) %v719_v3, 8 }
 0x456   :  { %v736_v4 = vpop.trf.xlu0 }
 0x457   :  { %752 = vst [vmem:[#allocation2] sm:$0xff] %v736_v4 }
 0x458   :  { %979 = shalt.err (!%p976_p4)
}
 0x459   :  { %s980_s27 = scalar_lea.hbm %s1314_s7, 128 }
 0x45a   :  { %p981_p5 = scmp.ne.s32.totalorder %s1314_s7, %s980_s27  ;;  %p984_p6 = scmp.lt.u32.totalorder %s980_s27, %s1314_s7 }
 0x45c   :  { %p986_p7 = pnand %p984_p6, %p981_p5 }
 0x45e   :  { %989 = shalt.err (!%p986_p7)
}
 0x45f   :  { %762 = dma.vmem_to_hbm [thread:$0]  %s760_s23, 128, %s1314_s7, [#allocation3]  }
 0x460   :  { %990 = dma.done.wait [#allocation3], 128  }
 0x461   :  { %991 = vsyncadd [#allocation3], 4294967168 }
 0x462   :  { %766 = vsyncpa [#allocation3], 1 }

</bundles_post_ra>
